<compile_context>
chip_gen: v7x
topology: tpu7x:2x2x1
jax: 0.10.0
libtpu: 0.0.40
codegen_flags: <defaults>
</compile_context>

<pallas_src>
import functools

import jax
import jax.numpy as jnp
from jax.experimental import pallas as pl
from jax.experimental.pallas import tpu as pltpu

_LANES = 128


def _mlp_kernel(x_ref, w1_ref, b1_ref, w2_ref, b2_ref, w3_ref, b3_ref, o_ref,
                *, pack_output):
    cdt = w1_ref.dtype  # MXU operand dtype (bf16 or f32); accumulation is always f32.

    x = x_ref[...].astype(cdt)

    # ---- layer 1 + sigmoid (MXU matmul, f32 accumulation, f32 activation math) ----
    h1 = jnp.dot(x, w1_ref[...], preferred_element_type=jnp.float32)
    h1 = jax.nn.sigmoid(h1 + b1_ref[...])

    # ---- layer 2 + sigmoid ----
    h2 = jnp.dot(h1.astype(cdt), w2_ref[...], preferred_element_type=jnp.float32)
    h2 = jax.nn.sigmoid(h2 + b2_ref[...])

    # ---- layer 3 (out_features == 1): per-lane multiply + cross-lane (XLU) reduce ----
    # (an N=1 MXU matmul would serialize a full push/drain for a single output column)
    r = jnp.sum(h2 * w3_ref[...], axis=-1, keepdims=True) + b3_ref[0]  # (block_b, 1) f32

    if pack_output:
        # Sublane->lane pack: 128 consecutive batch rows become one lane-dense output row
        # -> unmasked vst with 128x fewer writeback bytes than the broadcast slab.
        o_ref[...] = jnp.reshape(r, o_ref.shape).astype(o_ref.dtype)
    else:
        # Lane-dense slab: broadcast the per-row scalar across 128 lanes; the wrapper
        # slices out column 0.  Avoids masked 1-lane partial stores (vst.msk).
        o_ref[...] = jnp.broadcast_to(r, o_ref.shape).astype(o_ref.dtype)


def prepare_mlp_params(w1, b1, w2, b2, w3, b3, *, weight_dtype=jnp.bfloat16):
    """Pad / cast parameters ONCE (hoisted out of the per-forward path).

    Weights are stored (in, out) (transpose of torch nn.Linear.weight) so each layer
    computes y = x @ W + b, matching nn.Linear(x) = x @ weight.T + bias.
    The hidden dim is zero-padded to a lane multiple.  Numerically exact: padded h1/h2
    lanes hold sigmoid(0)=0.5 but multiply zeroed W2 rows / w3 entries, so they never
    reach the output.
    """
    D, H = w1.shape
    w3 = jnp.reshape(w3, (1, H))
    # v6e/v7x MXUs are 2x256x256 -> round to 256 once H is production-sized; keep 128 for
    # small H (v5e MXU tile is 128x128; padding a 64-wide toy H to 256 would waste FLOPs).
    mult = 256 if H >= 256 else _LANES
    Hp = ((H + mult - 1) // mult) * mult

    # Matmul operands in weight_dtype (bf16 default: half the DMA bytes, native MXU rate).
    w1p = jnp.zeros((D, Hp), jnp.float32).at[:, :H].set(w1).astype(weight_dtype)
    w2p = jnp.zeros((Hp, Hp), jnp.float32).at[:H, :H].set(w2).astype(weight_dtype)
    # Biases / w3 stay f32: added to / multiplied against the f32 accumulator, tiny footprint.
    b1p = jnp.zeros((1, Hp), jnp.float32).at[:, :H].set(jnp.reshape(b1, (1, H)))
    b2p = jnp.zeros((1, Hp), jnp.float32).at[:, :H].set(jnp.reshape(b2, (1, H)))
    w3p = jnp.zeros((1, Hp), jnp.float32).at[:, :H].set(w3)
    b3s = jnp.reshape(jnp.asarray(b3, jnp.float32), (1,))
    return (w1p, b1p, w2p, b2p, w3p, b3s)


def mlp_forward(x, params, *, block_b=None):
    """Fused forward: sigmoid(sigmoid(x@W1+b1)@W2+b2) @ w3 + b3 -> (B, 1) float32."""
    w1p, b1p, w2p, b2p, w3p, b3s = params
    B, D = x.shape
    Hp = w1p.shape[1]

    # Batch tiling:
    #   * >= 2 blocks whenever B > 8 so both v7x TensorCores get work on the "parallel" axis.
    #   * 512-row tiles for large B (~85% of HBM roofline); 1024 once B >= 2048 so the output
    #     can be sublane->lane packed while keeping the (8,128) block rule and grid >= 2.
    if block_b is None:
        if B >= 2048:
            block_b = 1024
        elif B > 512:
            block_b = 512
        else:
            block_b = max(8, ((pl.cdiv(B, 2) + 7) // 8) * 8)
    num_blocks = pl.cdiv(B, block_b)
    Bp = num_blocks * block_b
    if Bp != B:
        x = jnp.pad(x, ((0, Bp - B), (0, 0)))

    pack_output = (block_b % (8 * _LANES) == 0)  # needs block_b//128 to be a sublane multiple
    if pack_output:
        out_shape = jax.ShapeDtypeStruct((Bp // _LANES, _LANES), jnp.float32)
        out_spec = pl.BlockSpec((block_b // _LANES, _LANES), lambda i: (i, 0))
        out_block_elems = block_b
    else:
        out_shape = jax.ShapeDtypeStruct((Bp, _LANES), jnp.float32)
        out_spec = pl.BlockSpec((block_b, _LANES), lambda i: (i, 0))
        out_block_elems = block_b * _LANES

    # Grid-invariant operands: single-buffer them (double-buffering a constant block only
    # doubles its VMEM footprint, it never changes across grid steps).
    const = functools.partial(pl.BlockSpec, index_map=lambda i: (0, 0),
                              pipeline_mode=pl.Buffered(1))
    in_specs = [
        pl.BlockSpec((block_b, D), lambda i: (i, 0)),        # x tile (double-buffered)
        const((D, Hp)),                                      # W1 (resident, 1 buffer)
        const((1, Hp)),                                      # b1
        const((Hp, Hp)),                                     # W2 (resident, 1 buffer)
        const((1, Hp)),                                      # b2
        const((1, Hp)),                                      # w3 as a row (VPU reduce)
        pl.BlockSpec(memory_space=pltpu.MemorySpace.SMEM),   # b3 scalar in SMEM
    ]

    # Explicit VMEM budget: resident weights (single-buffered) + double-buffered x/out tiles
    # + f32 h1/h2 intermediates, with headroom; capped at v7x's 64 MiB physical VMEM.
    wbytes = ((w1p.size + w2p.size) * w1p.dtype.itemsize
              + (b1p.size + b2p.size + w3p.size) * 4)
    vmem_bytes = (wbytes
                  + 2 * block_b * D * 4          # x tiles (double-buffered)
                  + 2 * out_block_elems * 4      # out tiles (double-buffered)
                  + 2 * block_b * Hp * 4)        # h1 / h2 f32 intermediates
    vmem_limit = min(max(int(vmem_bytes * 1.5) + (1 << 20), 32 << 20), 64 << 20)
    # TODO(synk): at production Hp (>= ~4k) resident W2 no longer fits v7x's 64 MiB VMEM;
    # add a K/N grid axis for W2 with an f32 scratch accumulator (pl.when init/finalize,
    # that axis "arbitrary") instead of raising the limit further.

    cost = pl.CostEstimate(
        flops=2 * B * (D * Hp + Hp * Hp + Hp),
        transcendentals=2 * B * Hp,                       # two sigmoid layers (EUP exp)
        bytes_accessed=int(wbytes + B * D * 4 + B * 4))

    kernel = functools.partial(_mlp_kernel, pack_output=pack_output)
    out = pl.pallas_call(
        kernel,
        out_shape=out_shape,
        grid_spec=pltpu.PrefetchScalarGridSpec(
            num_scalar_prefetch=0,
            grid=(num_blocks,),
            in_specs=in_specs,
            out_specs=out_spec),
        compiler_params=pltpu.CompilerParams(
            dimension_semantics=("parallel",),
            vmem_limit_bytes=vmem_limit),
        cost_estimate=cost,
    )(x, w1p, b1p, w2p, b2p, w3p, b3s)

    if pack_output:
        return jnp.reshape(out, (Bp, 1))[:B]
    return out[:B, :1]


def _xavier_normal(key, fan_in, fan_out):
    # matches nn.init.xavier_normal_: std = sqrt(2 / (fan_in + fan_out)); stored (in, out)
    std = (2.0 / (fan_in + fan_out)) ** 0.5
    return std * jax.random.normal(key, (fan_in, fan_out), dtype=jnp.float32)


if __name__ == "__main__":
    input_dim, hidden_dim, batch = 32, 64, 16

    key = jax.random.PRNGKey(0)
    kx, k1, k2, k3 = jax.random.split(key, 4)

    x = jax.random.normal(kx, (batch, input_dim), dtype=jnp.float32)

    w1 = _xavier_normal(k1, input_dim, hidden_dim)
    b1 = jnp.zeros((hidden_dim,), jnp.float32)
    w2 = _xavier_normal(k2, hidden_dim, hidden_dim)
    b2 = jnp.zeros((hidden_dim,), jnp.float32)
    w3 = _xavier_normal(k3, hidden_dim, 1)
    b3 = jnp.zeros((1,), jnp.float32)

    # pure-JAX reference
    ref = jax.nn.sigmoid(x @ w1 + b1)
    ref = jax.nn.sigmoid(ref @ w2 + b2)
    ref = ref @ w3 + b3

    # f32-weight path: tight check of the fused-kernel math.
    params_f32 = prepare_mlp_params(w1, b1, w2, b2, w3, b3, weight_dtype=jnp.float32)
    out_f32 = jax.block_until_ready(mlp_forward(x, params_f32))
    assert out_f32.shape == (batch, 1)
    assert jnp.allclose(out_f32, ref, atol=1e-5, rtol=1e-5), "f32 mismatch vs reference"

    # bf16-weight path (perf default): f32 accumulation kept, looser tolerance.
    params_bf16 = prepare_mlp_params(w1, b1, w2, b2, w3, b3)  # weight_dtype=bfloat16
    out_bf16 = jax.block_until_ready(mlp_forward(x, params_bf16))
    assert out_bf16.shape == (batch, 1)
    assert jnp.allclose(out_bf16, ref, atol=2e-2, rtol=2e-2), "bf16 mismatch vs reference"

    print("KERNEL_OK")
</pallas_src>

<mosaic_0001>
module attributes {stable_mosaic.version = 11 : i64} {
  func.func @_mlp_kernel(%arg0: i32, %arg1: memref<8x32xf32, #tpu.memory_space<vmem>>, %arg2: memref<32x128xf32, #tpu.memory_space<vmem>>, %arg3: memref<1x128xf32, #tpu.memory_space<vmem>>, %arg4: memref<128x128xf32, #tpu.memory_space<vmem>>, %arg5: memref<1x128xf32, #tpu.memory_space<vmem>>, %arg6: memref<1x128xf32, #tpu.memory_space<vmem>>, %arg7: memref<1xf32, #tpu.memory_space<smem>>, %arg8: memref<8x128xf32, #tpu.memory_space<vmem>>) attributes {dimension_semantics = [#tpu.dimension_semantics<parallel>], iteration_bounds = array<i64: 2>, scalar_prefetch = 0 : i64, scratch_operands = 0 : i64, tpu.core_type = #tpu.core_type<tc>, window_params = [{transform_indices = @transform_0, window_bounds = array<i64: 8, 32>}, {pipeline_mode = #tpu.pipeline_mode<synchronous>, transform_indices = @transform_1, window_bounds = array<i64: 32, 128>}, {pipeline_mode = #tpu.pipeline_mode<synchronous>, transform_indices = @transform_2, window_bounds = array<i64: 1, 128>}, {pipeline_mode = #tpu.pipeline_mode<synchronous>, transform_indices = @transform_3, window_bounds = array<i64: 128, 128>}, {pipeline_mode = #tpu.pipeline_mode<synchronous>, transform_indices = @transform_4, window_bounds = array<i64: 1, 128>}, {pipeline_mode = #tpu.pipeline_mode<synchronous>, transform_indices = @transform_5, window_bounds = array<i64: 1, 128>}, {transform_indices = @transform_6, window_bounds = array<i64: 1>}, {transform_indices = @transform_7, window_bounds = array<i64: 8, 128>}]} {
    %c0 = arith.constant 0 : index
    %c0_0 = arith.constant 0 : index
    %0 = vector.load %arg1[%c0, %c0_0] : memref<8x32xf32, #tpu.memory_space<vmem>>, vector<8x32xf32>
    %c0_1 = arith.constant 0 : index
    %c0_2 = arith.constant 0 : index
    %1 = vector.load %arg2[%c0_1, %c0_2] : memref<32x128xf32, #tpu.memory_space<vmem>>, vector<32x128xf32>
    %cst = arith.constant dense<0.000000e+00> : vector<8x128xf32>
    %2 = tpu.matmul %0, %1, %cst {dimension_numbers = #tpu.dot_dimension_numbers<[1], [0], [0], [1], [0, 0, 1, 1], [], []>} : vector<8x32xf32>, vector<32x128xf32>, vector<8x128xf32> -> vector<8x128xf32>
    %c0_3 = arith.constant 0 : index
    %c0_4 = arith.constant 0 : index
    %3 = vector.load %arg3[%c0_3, %c0_4] : memref<1x128xf32, #tpu.memory_space<vmem>>, vector<1x128xf32>
    %4 = vector.broadcast %3 : vector<1x128xf32> to vector<8x128xf32>
    %5 = arith.addf %2, %4 : vector<8x128xf32>
    %6 = arith.negf %5 : vector<8x128xf32>
    %7 = math.exp %6 : vector<8x128xf32>
    %cst_5 = arith.constant 1.000000e+00 : f32
    %8 = vector.broadcast %cst_5 : f32 to vector<8x128xf32>
    %9 = arith.addf %8, %7 : vector<8x128xf32>
    %10 = arith.divf %8, %9 : vector<8x128xf32>
    %c0_6 = arith.constant 0 : index
    %c0_7 = arith.constant 0 : index
    %11 = vector.load %arg4[%c0_6, %c0_7] : memref<128x128xf32, #tpu.memory_space<vmem>>, vector<128x128xf32>
    %cst_8 = arith.constant dense<0.000000e+00> : vector<8x128xf32>
    %12 = tpu.matmul %10, %11, %cst_8 {dimension_numbers = #tpu.dot_dimension_numbers<[1], [0], [0], [1], [0, 0, 1, 1], [], []>} : vector<8x128xf32>, vector<128x128xf32>, vector<8x128xf32> -> vector<8x128xf32>
    %c0_9 = arith.constant 0 : index
    %c0_10 = arith.constant 0 : index
    %13 = vector.load %arg5[%c0_9, %c0_10] : memref<1x128xf32, #tpu.memory_space<vmem>>, vector<1x128xf32>
    %14 = vector.broadcast %13 : vector<1x128xf32> to vector<8x128xf32>
    %15 = arith.addf %12, %14 : vector<8x128xf32>
    %16 = arith.negf %15 : vector<8x128xf32>
    %17 = math.exp %16 : vector<8x128xf32>
    %cst_11 = arith.constant 1.000000e+00 : f32
    %18 = vector.broadcast %cst_11 : f32 to vector<8x128xf32>
    %19 = arith.addf %18, %17 : vector<8x128xf32>
    %20 = arith.divf %18, %19 : vector<8x128xf32>
    %c0_12 = arith.constant 0 : index
    %c0_13 = arith.constant 0 : index
    %21 = vector.load %arg6[%c0_12, %c0_13] : memref<1x128xf32, #tpu.memory_space<vmem>>, vector<1x128xf32>
    %22 = vector.broadcast %21 : vector<1x128xf32> to vector<8x128xf32>
    %23 = arith.mulf %20, %22 : vector<8x128xf32>
    %cst_14 = arith.constant dense<0.000000e+00> : vector<8xf32>
    %24 = vector.multi_reduction <add>, %23, %cst_14 [1] : vector<8x128xf32> to vector<8xf32>
    %25 = vector.shape_cast %24 : vector<8xf32> to vector<8x1xf32>
    %c0_15 = arith.constant 0 : index
    %26 = memref.load %arg7[%c0_15] : memref<1xf32, #tpu.memory_space<smem>>
    %27 = vector.broadcast %26 : f32 to vector<8x1xf32>
    %28 = arith.addf %25, %27 : vector<8x1xf32>
    %29 = vector.shape_cast %28 : vector<8x1xf32> to vector<8x1xf32>
    %30 = vector.broadcast %29 : vector<8x1xf32> to vector<8x128xf32>
    %c0_16 = arith.constant 0 : index
    %c0_17 = arith.constant 0 : index
    %31 = vector.load %arg8[%c0_16, %c0_17] : memref<8x128xf32, #tpu.memory_space<vmem>>, vector<8x128xf32>
    tpu.vector_store %arg8[%c0_16, %c0_17], %30 {strides = array<i32>} : memref<8x128xf32, #tpu.memory_space<vmem>>, vector<8x128xf32>,
    return
  }
  func.func @transform_0(%arg0: i32) -> (i32, i32) {
    %c0_i32 = arith.constant 0 : i32
    %c0_i32_0 = arith.constant 0 : i32
    return %arg0, %c0_i32 : i32, i32
  }
  func.func @transform_1(%arg0: i32) -> (i32, i32) {
    %c0_i32 = arith.constant 0 : i32
    %c0_i32_0 = arith.constant 0 : i32
    %c0_i32_1 = arith.constant 0 : i32
    return %c0_i32, %c0_i32_0 : i32, i32
  }
  func.func @transform_2(%arg0: i32) -> (i32, i32) {
    %c0_i32 = arith.constant 0 : i32
    %c0_i32_0 = arith.constant 0 : i32
    %c0_i32_1 = arith.constant 0 : i32
    return %c0_i32, %c0_i32_0 : i32, i32
  }
  func.func @transform_3(%arg0: i32) -> (i32, i32) {
    %c0_i32 = arith.constant 0 : i32
    %c0_i32_0 = arith.constant 0 : i32
    %c0_i32_1 = arith.constant 0 : i32
    return %c0_i32, %c0_i32_0 : i32, i32
  }
  func.func @transform_4(%arg0: i32) -> (i32, i32) {
    %c0_i32 = arith.constant 0 : i32
    %c0_i32_0 = arith.constant 0 : i32
    %c0_i32_1 = arith.constant 0 : i32
    return %c0_i32, %c0_i32_0 : i32, i32
  }
  func.func @transform_5(%arg0: i32) -> (i32, i32) {
    %c0_i32 = arith.constant 0 : i32
    %c0_i32_0 = arith.constant 0 : i32
    %c0_i32_1 = arith.constant 0 : i32
    return %c0_i32, %c0_i32_0 : i32, i32
  }
  func.func @transform_6(%arg0: i32) -> i32 {
    %c0_i32 = arith.constant 0 : i32
    %c0_i32_0 = arith.constant 0 : i32
    return %c0_i32 : i32
  }
  func.func @transform_7(%arg0: i32) -> (i32, i32) {
    %c0_i32 = arith.constant 0 : i32
    %c0_i32_0 = arith.constant 0 : i32
    return %arg0, %c0_i32 : i32, i32
  }
}

</mosaic_0001>

<bundles_post_ra>
// kernel: tpu_custom_call.1
= control target key start
LH: loop header
LB: loop body
LE: loop exit
PB: predicated region body
PF: predicated region fallthrough
CT: control target
= control target key end

     0   :  { %s1284_s0 = inlined_call_operand.hbm [shape: f32[16,32], index: 0, kind: input, shape index: {}]   ;;  %s1285_s1 = inlined_call_operand.hbm [shape: f32[32,128], index: 1, kind: input, shape index: {}]   ;;  %s1286_s2 = inlined_call_operand.vmem [shape: f32[1,128], index: 2, kind: input, shape index: {}]   ;;  %s1287_s3 = inlined_call_operand.hbm [shape: f32[128,128], index: 3, kind: input, shape index: {}]   ;;  %s1288_s4 = inlined_call_operand.vmem [shape: f32[1,128], index: 4, kind: input, shape index: {}]   ;;  %s1289_s5 = inlined_call_operand.vmem [shape: f32[1,128], index: 5, kind: input, shape index: {}]   ;;  %s1290_s6 = inlined_call_operand.<no memory space> [shape: f32[1], index: 6, kind: input, shape index: {}]   ;;  %s1291_s7 = inlined_call_operand.hbm [shape: f32[16,128], index: 7, kind: output, shape index: {}]  }
   0x1   :  { %12 = sst [smem:[#allocation2]] %s1290_s6 }
   0x2   :  { %13 = vsyncpa [#allocation4], 0 }
   0x3   :  { %15 = vsyncpa [#allocation4 + $0x1], 0 }
   0x4   :  { %16 = vsyncpa [#allocation7], 0 }
   0x5   :  { %17 = vsyncpa [#allocation5], 0 }
   0x6   :  { %19 = vsyncpa [#allocation5 + $0x1], 0  ;;  %s1042_s26 = smov 0   ;;  %s1044_s27 = smov 0  }
   0x7   :  { %s1046_s28 = smov 0   ;;  %s1048_s29 = smov 0  }
   0x8 LB: > { %s1063_s6 = sadd.s32 4294967295, %s988_s29   ;;  %s632_s30 = sadd.s32 4294967294, %s988_s29   ;;  %s988_s29 = sphi %s1048_s29, %s1311_s29   ;;  %s984_s28 = sphi %s1046_s28, %s1310_s28   ;;  %s980_s27 = sphi %s1044_s27, %s1309_s27   ;;  %s976_s26 = sphi %s1042_s26, %s1308_s26  }
   0x9   : > { %p45_p0 = scmp.ne.s32.totalorder %s980_s27, %s976_s26  ;;  %p1292_p1 = scmp.eq.s32.totalorder %s1063_s6, 0 }
   0xa   : > { %p201_p3 = scmp.eq.s32.totalorder %s632_s30, 1  ;;  %p633_p5 = scmp.ge.s32.totalorder %s988_s29, 1 }
   0xb   : > { %p1072_p4 = por %p1292_p1, %p45_p0  ;;  %p208_p7 = scmp.lt.s32.totalorder %s988_s29, 3 }
   0xc   : > { %p1077_p6 = por %p201_p3, %p45_p0  ;;  %s990_s11 = smov [#allocation6]  }
   0xd   : > { %s1295_s8 = scalar_select %p1072_p4, 1, 0 }
   0xe   : > { %s1296_s9 = scalar_select %p1077_p6, 1, 0 }
   0xf   : > { %p1082_p8 = pnand %p633_p5, %p208_p7  ;;  %s220_s12 = sshll.u32 %s990_s11, 4  ;;  %s1086_s12 = int_to_ptr.vmem [resolvable:$true] %s220_s12 }
  0x10   : > { %s991_s14 = smov [#allocation8]   ;;  %s832_s18 = scalar_lea.hbm %s1285_s1, 512 }
  0x11   : > { %p764_p9 = pneg %p1082_p8  ;;  %s236_s15 = sshll.u32 %s991_s14, 4  ;;  %s1097_s15 = int_to_ptr.vmem [resolvable:$true] %s236_s15 }
  0x12   : > { %p833_p12 = scmp.ne.s32.totalorder %s1285_s1, %s832_s18  ;;  %p839_p5 = scmp.lt.u32.totalorder %s832_s18, %s1285_s1 }
  0x13   : > { %p1093_p11 = pnand %p764_p9, %p1292_p1 }
  0x15   : > { %p834_p13 = pneg %p1093_p11 }
  0x17   : > { %p835_p0 = pnand %p834_p13, %p833_p12 }
  0x19   : > { %p836_p3 = pneg %p835_p0 }
  0x1b   : > { %p841_p7 = pnand %p839_p5, %p836_p3 }
  0x1d   : > { %844 = shalt.err (!%p841_p7)
}
  0x1e   : > { %s845_s23 = scalar_lea.vmem %s1086_s12, 512  ;;  %p853_p2 = scmp.lt.s32.totalorder %s1086_s12, %s1086_s12 }
  0x1f   : > { %p846_p9 = scmp.ne.s32.totalorder %s1086_s12, %s845_s23  ;;  %p854_p12 = scmp.lt.s32.totalorder %s845_s23, %s845_s23 }
  0x21   : > { %p848_p10 = pnand %p846_p9, %p834_p13  ;;  %p855_p0 = por %p854_p12, %p853_p2 }
  0x23   : > { %p849_p1 = pneg %p848_p10 }
  0x25   : > { %p856_p6 = pnand %p855_p0, %p849_p1 }
  0x27   : > { %859 = shalt.err (!%p856_p6)
}
  0x28   : > { %s992_s24 = smov 128   ;;  %s993_s25 = smov 8  }
  0x29   : > { %767 = dma.hbm_to_vmem [thread:$0]  (!%p1093_p11), %s1285_s1, 512, %s1086_s12, [#allocation7], %s992_s24, %s992_s24, %s993_s25  }
  0x2a   : > { %s860_s17 = scalar_lea.hbm %s1287_s3, 2048 }
  0x2b   : > { %p861_p2 = scmp.ne.s32.totalorder %s1287_s3, %s860_s17  ;;  %p867_p10 = scmp.lt.u32.totalorder %s860_s17, %s1287_s3 }
  0x2d   : > { %p863_p1 = pnand %p861_p2, %p834_p13 }
  0x2f   : > { %p864_p6 = pneg %p863_p1 }
  0x31   : > { %p869_p3 = pnand %p867_p10, %p864_p6 }
  0x33   : > { %872 = shalt.err (!%p869_p3)
}
  0x34   : > { %s873_s12 = scalar_lea.vmem %s1097_s15, 2048  ;;  %p881_p12 = scmp.lt.s32.totalorder %s1097_s15, %s1097_s15 }
  0x35   : > { %p874_p5 = scmp.ne.s32.totalorder %s1097_s15, %s873_s12  ;;  %p882_p0 = scmp.lt.s32.totalorder %s873_s12, %s873_s12 }
  0x37   : > { %p876_p7 = pnand %p874_p5, %p834_p13  ;;  %p883_p2 = por %p882_p0, %p881_p12 }
  0x39   : > { %p877_p9 = pneg %p876_p7 }
  0x3b   : > { %p884_p1 = pnand %p883_p2, %p877_p9 }
  0x3d   : > { %887 = shalt.err (!%p884_p1)
}
  0x3e   : > { %770 = dma.hbm_to_vmem [thread:$0]  (!%p1093_p11), %s1287_s3, 2048, %s1097_s15, [#allocation7], %s992_s24, %s992_s24, %s993_s25  }
  0x3f   : > { %s1152_s30 = sadd.s32 1, %s988_s29   ;;  %s32_s13 = sadd.s32 1, %s984_s28 }
  0x40   : > { %s29_s11 = ssub.s32 %s988_s29, %s1152_s30  ;;  %p39_p13 = scmp.ne.s32.totalorder %s984_s28, %s980_s27 }
  0x41   : > { %p30_p6 = scmp.eq.s32.totalorder %s29_s11, 0  ;;  %p40_p10 = scmp.eq.s32.totalorder %s988_s29, 0 }
  0x42   : > { %p1299_p3 = scmp.eq.s32.totalorder %s1063_s6, 1  ;;  %p781_p7 = scmp.lt.s32.totalorder %s988_s29, 2 }
  0x43   : > { %s1168_s16 = scalar_select %p30_p6, %s984_s28, %s32_s13  }
  0x44   : > { %p1162_p5 = por %p1299_p3, %p39_p13  ;;  %p41_p9 = por %p40_p10, %p39_p13 }
  0x45   : > { %s259_s17 = sand.u32 1, %s984_s28   ;;  %s638_s15 = sshll.u32 %s988_s29, 7 }
  0x46   : > { %s1300_s14 = scalar_select %p1162_p5, 1, 0 }
  0x47   : > { %s637_s18 = sshll.u32 %s259_s17, 3  ;;  %s1175_s19 = scalar_lea.hbm %s1284_s0, %s638_s15 }
  0x48   : > { %s263_s20 = scalar_lea.vmem [#allocation3], %s637_s18  ;;  %p1179_p11 = pnand %p781_p7, %p41_p9 }
  0x49   : > { %s270_s21 = sshll.u32 %s263_s20, 4  ;;  %s260_s22 = scalar_lea.sflag [#allocation4], %s259_s17  ;;  %s1177_s21 = int_to_ptr.vmem [resolvable:$true] %s270_s21 }
  0x4a   : > { %s888_s23 = scalar_lea.hbm %s1175_s19, 128  ;;  %p890_p0 = pneg %p1179_p11 }
  0x4b   : > { %p889_p12 = scmp.ne.s32.totalorder %s1175_s19, %s888_s23  ;;  %s893_s18 = scalar_lea.hbm %s1284_s0, 256 }
  0x4c   : > { %p894_p13 = scmp.lt.u32.totalorder %s1175_s19, %s1284_s0  ;;  %p895_p6 = scmp.lt.u32.totalorder %s893_s18, %s888_s23 }
  0x4d   : > { %p891_p2 = pnand %p890_p0, %p889_p12  ;;  %p897_p3 = scmp.lt.u32.totalorder %s888_s23, %s1175_s19 }
  0x4e   : > { %p896_p10 = por %p895_p6, %p894_p13 }
  0x4f   : > { %p892_p1 = pneg %p891_p2 }
  0x50   : > { %p898_p7 = por %p897_p3, %p896_p10 }
  0x52   : > { %p899_p9 = pnand %p898_p7, %p892_p1 }
  0x54   : > { %902 = shalt.err (!%p899_p9)
}
  0x55   : > { %s903_s17 = scalar_lea.vmem %s1177_s21, 128  ;;  %s994_s25 = smov [#allocation3]  }
  0x56   : > { %p904_p12 = scmp.ne.s32.totalorder %s1177_s21, %s903_s17  ;;  %s908_s20 = sshll.u32 %s994_s25, 4  ;;  %s909_s20 = int_to_ptr.vmem [resolvable:$false] %s908_s20 }
  0x57   : > { %s910_s13 = scalar_lea.vmem %s909_s20, 256  ;;  %p911_p4 = scmp.lt.s32.totalorder %s1177_s21, %s909_s20 }
  0x58   : > { %p906_p2 = pnand %p904_p12, %p890_p0  ;;  %p912_p13 = scmp.lt.s32.totalorder %s910_s13, %s903_s17 }
  0x5a   : > { %p907_p5 = pneg %p906_p2  ;;  %p913_p6 = por %p912_p13, %p911_p4 }
  0x5c   : > { %p914_p10 = pnand %p913_p6, %p907_p5 }
  0x5e   : > { %917 = shalt.err (!%p914_p10)
}
  0x5f   : > { %774 = dma.hbm_to_vmem [thread:$0]  (!%p1179_p11), %s1175_s19, 128, %s1177_s21, %s260_s22  }
  0x60   : > { %279 = sbr.rel (%p1082_p8) target bundleno = 757 (0x2f5), region = 48  ;;  %s1211_s23 = sand.u32 (!%p1082_p8), 1, %s980_s27  }
  0x61   : > { %s640_s11 = sshll.u32 (!%p1082_p8), %s1211_s23, 3  ;;  %s282_s18 = scalar_lea.sflag (!%p1082_p8), [#allocation4], %s1211_s23 }
  0x62   : > { %s285_s15 = scalar_lea.vmem (!%p1082_p8), [#allocation3], %s640_s11  ;;  %p1302_p4 = scmp.ne.s32.totalorder (!%p1082_p8), %s1295_s8, 0 }
  0x67   : > { %963 = dma.done.wait (%p1302_p4), %s282_s18, 128  }
  0x68   : > { %965 = vsyncadd (%p1302_p4), %s282_s18, 4294967168  ;;  %p1303_p5 = scmp.eq.s32.totalorder %s1063_s6, 0 }
  0x6a   : > { %967 = dma.done.wait (%p1303_p5), [#allocation7], 2560   ;;  %p1304_p8 = pmov %p1303_p5 }
  0x6b   : > { %v995_v0 = vmov 0.0|0.0   ;;  %vm996_vm0 = vmmov 0   ;;  %v997_v1 = vmov 0.0   ;;  %v325_v2 = vld [vmem:[#allocation6] sm:$0xff]  ;;  %v326_v3 = vld [vmem:[#allocation6 + $0x8] sm:$0xff]  ;;  %v327_v4 = vld [vmem:[#allocation6 + $0x10] sm:$0xff] }
  0x6c   : > { %969 = vsyncadd (%p1304_p8), [#allocation7], 4294964736  ;;  %722 = vmatprep.subr.bf16.mxu0 %v995_v0  ;;  %684 = vmatprep.mubr.msk.f32.mxu0 %vm996_vm0, %v997_v1  ;;  %v723_v5 = vpack.c.bf16 %v326_v3, %v325_v2  ;;  %v328_v6 = vld [vmem:[#allocation6 + $0x18] sm:$0xff]  ;;  %v416_v7 = vld [vmem:[#allocation8] sm:$0xff]  ;;  %vm336_vm1 = vcmask 261120   ;;  %s525_s24 = sld [smem:[#allocation2]] }
  0x6d   : > { %728 = vmatprep.subr.bf16.mxu1 %v995_v0  ;;  %719 = vmatprep.mubr.msk.f32.mxu1 %vm996_vm0, %v997_v1  ;;  %v417_v8 = vld [vmem:[#allocation8 + $0x8] sm:$0xff]  ;;  %v726_v9 = vpack.c.bf16 %v328_v6, %v327_v4  ;;  %v324_v11 = vld [vmem:[%s285_s15] sm:$0xff]  ;;  %v420_v15 = vld [vmem:[#allocation8 + $0x20] sm:$0xff]  ;;  %s651_s17 = sshll.u32 %s1063_s6, 7  ;;  %s323_s25 = scalar_lea.vmem [#allocation9], %s640_s11 }
  0x6e   : > { %724 = vmatpush3.bf16.msra.mxu0 %v723_v5  ;;  %v729_v10 = vpack.c.bf16 %v417_v8, %v416_v7  ;;  %v418_v12 = vld [vmem:[#allocation8 + $0x10] sm:$0xff]  ;;  %v419_v13 = vld [vmem:[#allocation8 + $0x18] sm:$0xff]  ;;  %v421_v16 = vld [vmem:[#allocation8 + $0x28] sm:$0xff]  ;;  %s543_s20 = sshll.u32 %s323_s25, 4  ;;  %s1240_s15 = scalar_lea.hbm %s1291_s7, %s651_s17  ;;  %s1242_s20 = int_to_ptr.vmem [resolvable:$true] %s543_s20 }
  0x6f   : > { %725 = vmatprep.subr.bf16.mxu0 %v995_v0  ;;  %v732_v14 = vpack.c.bf16 %v419_v13, %v418_v12  ;;  %v735_v17 = vpack.c.bf16 %v421_v16, %v420_v15  ;;  %v422_v18 = vld [vmem:[#allocation8 + $0x30] sm:$0xff]  ;;  %v423_v19 = vld [vmem:[#allocation8 + $0x38] sm:$0xff]  ;;  %v424_v21 = vld [vmem:[#allocation8 + $0x40] sm:$0xff]  ;;  %s530_s8 = scalar_lea.sflag [#allocation5], %s1211_s23  ;;  %s918_s10 = scalar_lea.vmem %s1242_s20, 128 }
  0x70   : > { %730 = vmatpush3.bf16.msra.mxu1 %v729_v10  ;;  %v738_v20 = vpack.c.bf16 %v423_v19, %v422_v18  ;;  %v425_v22 = vld [vmem:[#allocation8 + $0x48] sm:$0xff]  ;;  %v426_v24 = vld [vmem:[#allocation8 + $0x50] sm:$0xff]  ;;  %v427_v25 = vld [vmem:[#allocation8 + $0x58] sm:$0xff]  ;;  %p919_p11 = scmp.ne.s32.totalorder %s1242_s20, %s918_s10  ;;  %p1305_p0 = scmp.ne.s32.totalorder %s1300_s14, 0 }
  0x71   : > { %731 = vmatprep.subr.bf16.mxu1 %v995_v0  ;;  %v741_v23 = vpack.c.bf16 %v425_v22, %v424_v21  ;;  %v744_v26 = vpack.c.bf16 %v427_v25, %v426_v24  ;;  %v428_v27 = vld [vmem:[#allocation8 + $0x60] sm:$0xff]  ;;  %v429_v28 = vld [vmem:[#allocation8 + $0x68] sm:$0xff]  ;;  %v430_v30 = vld [vmem:[#allocation8 + $0x70] sm:$0xff]  ;;  %s998_s6 = smov [#allocation9]  }
  0x72   : > { %727 = vmatpush3.bf16.msra.mxu0 %v726_v9  ;;  %v747_v29 = vpack.c.bf16 %v429_v28, %v428_v27  ;;  %v431_v31 = vld [vmem:[#allocation8 + $0x78] sm:$0xff]  ;;  %v644_v33 = vld [vmem:[%s1286_s2] ss:$0 sm:$0xff]  ;;  %v526_v51 = vstv %s525_s24  ;;  %p920_p1 = pnand %p919_p11, %p1305_p0  ;;  %s922_s11 = sshll.u32 %s998_s6, 4  ;;  %s923_s11 = int_to_ptr.vmem [resolvable:$false] %s922_s11 }
  0x73   : > { %v750_v32 = vpack.c.bf16 %v431_v31, %v430_v30  ;;  %v647_v41 = vld [vmem:[%s1288_s4] ss:$0 sm:$0xff]  ;;  %s924_s19 = scalar_lea.vmem %s923_s11, 256  ;;  %p925_p7 = scmp.lt.s32.totalorder %s1242_s20, %s923_s11 }
  0x74   : > { %733 = vmatpush3.bf16.msra.mxu1 %v732_v14  ;;  %v649_v48 = vld [vmem:[%s1289_s5] ss:$0 sm:$0xff]  ;;  %p921_p3 = pneg %p920_p1  ;;  %p926_p9 = scmp.lt.s32.totalorder %s924_s19, %s918_s10 }
  0x75   : > { %685 = vmatmul.mubr.msk.f32.vlgmr.msra.gmra.mrb[0].mxu0 %vm336_vm1, %v324_v11  ;;  %734 = vmatprep.subr.bf16.mxu1 %v995_v0 }
  0x76   : > { %p927_p12 = por %p926_p9, %p925_p7 }
  0x78   : > { %736 = vmatpush3.bf16.msra.mxu1 %v735_v17  ;;  %p928_p2 = pnand %p927_p12, %p921_p3 }
  0x79   : > { %737 = vmatprep.subr.bf16.mxu1 %v995_v0 }
  0x7c   : > { %739 = vmatpush3.bf16.msra.mxu1 %v738_v20 }
  0x7d   : > { %740 = vmatprep.subr.bf16.mxu1 %v995_v0 }
  0x80   : > { %742 = vmatpush3.bf16.msra.mxu1 %v741_v23 }
  0x81   : > { %743 = vmatprep.subr.bf16.mxu1 %v995_v0 }
  0x84   : > { %745 = vmatpush3.bf16.msra.mxu1 %v744_v26 }
  0x85   : > { %746 = vmatprep.subr.bf16.mxu1 %v995_v0 }
  0x88   : > { %748 = vmatpush3.bf16.msra.mxu1 %v747_v29 }
  0x89   : > { %749 = vmatprep.subr.bf16.mxu1 %v995_v0 }
  0x8c   : > { %751 = vmatpush3.bf16.msra.mxu1 %v750_v32 }
 0x148   : > { %v406_v34 = vpop.f32.mrb[0].mxu0 }
 0x149   : > { %v407_v35 = vadd.f32 %v644_v33, %v406_v34  ;;  %v686_v36 = vpop.f32.mrb[1].mxu0 }
 0x14b   : > { %v646_v37 = vmul.f32 -1.442695, %v407_v35 }
 0x14d   : > { %824 = vpow2.f32 %v646_v37 }
 0x157   : > { %v825_v38 = vpop.eup %824 }
 0x158   : > { %v413_v39 = vadd.f32 1.0, %v825_v38 }
 0x15a   : > { %826 = vrcp.f32 %v413_v39 }
 0x164   : > { %v827_v40 = vpop.eup %826 }
 0x165   : > { %720 = vmatmul.mubr.f32.vlgmr.msra.gmra.mrb[0].mxu1 %v827_v40 }
 0x238   : > { %v505_v42 = vpop.f32.mrb[0].mxu1 }
 0x239   : > { %v506_v43 = vadd.f32 %v647_v41, %v505_v42  ;;  %v721_v44 = vpop.f32.mrb[1].mxu1 }
 0x23b   : > { %v648_v45 = vmul.f32 -1.442695, %v506_v43 }
 0x23d   : > { %828 = vpow2.f32 %v648_v45 }
 0x247   : > { %v829_v46 = vpop.eup %828 }
 0x248   : > { %v512_v47 = vadd.f32 1.0, %v829_v46 }
 0x24a   : > { %830 = vrcp.f32 %v512_v47 }
 0x254   : > { %v831_v49 = vpop.eup %830 }
 0x255   : > { %v522_v50 = vmul.f32 %v831_v49, %v649_v48 }
 0x257   : > { %523 = vadd.xlane.f32.xlu0 %v522_v50 }
 0x2e4   : > { %v524_v52 = vpop.xlane.xlu0 %523 }
 0x2e5   : > { %v527_v53 = vadd.f32 %v526_v51, %v524_v52 }
 0x2e7   : > { %528 = vst [vmem:[%s323_s25] sm:$0xff] %v527_v53 }
 0x2e8   : > { %931 = shalt.err (!%p928_p2)
}
 0x2e9   : > { %s932_s23 = scalar_lea.hbm %s1240_s15, 128  ;;  %s936_s22 = scalar_lea.hbm %s1291_s7, 256 }
 0x2ea   : > { %p933_p13 = scmp.ne.s32.totalorder %s1240_s15, %s932_s23  ;;  %p937_p4 = scmp.lt.u32.totalorder %s1240_s15, %s1291_s7 }
 0x2eb   : > { %p938_p5 = scmp.lt.u32.totalorder %s936_s22, %s932_s23  ;;  %p940_p11 = scmp.lt.u32.totalorder %s932_s23, %s1240_s15 }
 0x2ec   : > { %p934_p6 = pnand %p933_p13, %p1305_p0 }
 0x2ed   : > { %p939_p8 = por %p938_p5, %p937_p4 }
 0x2ee   : > { %p935_p10 = pneg %p934_p6 }
 0x2ef   : > { %p941_p1 = por %p940_p11, %p939_p8 }
 0x2f1   : > { %p942_p3 = pnand %p941_p1, %p935_p10 }
 0x2f3   : > { %945 = shalt.err (!%p942_p3)
}
 0x2f4   : > { %762 = dma.vmem_to_hbm [thread:$0]  (%p1305_p0), %s1242_s20, 128, %s1240_s15, %s530_s8  }
 0x2f5 PF: > { %s555_s25 = sand.u32 1, %s976_s26   ;;  %p1306_p7 = scmp.ne.s32.totalorder %s1296_s9, 0 }
 0x2f6   : > { %p1307_p9 = scmp.ge.s32.totalorder %s988_s29, 2  ;;  %s556_s13 = scalar_lea.sflag [#allocation5], %s555_s25 }
 0x2f8   : > { %p776_p12 = pnand %p1307_p9, %p1306_p7 }
 0x2fa   : > { %971 = dma.done.wait (!%p776_p12), %s556_s13, 128  }
 0x2fb   : > { %973 = vsyncadd (!%p776_p12), %s556_s13, 4294967168  ;;  %p22_p2 = scmp.ge.s32.totalorder %s1152_s30, 4   ;;  %s1308_s26 = smov %s980_s27 }
 0x2fc   : > { %s1309_s27 = smov %s984_s28  ;;  %s1310_s28 = smov %s1168_s16 }
 0x2fd   : > { %s1311_s29 = smov %s1152_s30  ;;  %24 = sbr.rel (!%p22_p2) target bundleno = 8 (0x8), region = 101 }
 0x304   :  { %561 = vsyncpa [#allocation4], 1 }
 0x305   :  { %563 = vsyncpa [#allocation4 + $0x1], 1 }
 0x306   :  { %564 = vsyncpa [#allocation7], 1 }
 0x307   :  { %565 = vsyncpa [#allocation5], 1 }
 0x308   :  { %567 = vsyncpa [#allocation5 + $0x1], 1 }

</bundles_post_ra>
